<compile_context>
chip_gen: v6e
topology: v6e:2x2x1
jax: 0.10.0
libtpu: 0.0.40
codegen_flags: <defaults>
</compile_context>

<pallas_src>
import functools

import jax
import jax.numpy as jnp
import numpy as np
from jax.experimental import pallas as pl
from jax.experimental.pallas import tpu as pltpu

EPS = 1e-8
_F32_TEMPS_PER_ELEM = 6            # a, nb, a_exp/a_prob, n_exp/n_prob, products
_MAX_TILE_B = 4096                 # raised from 512 per review
_FALLBACK_VMEM_BYTES = 64 * 1024 * 1024   # v7x per-TC physical = safe lower bound


def _round_up(x, m):
    return ((x + m - 1) // m) * m


def _vmem_capacity_bytes():
    """Physical VMEM per core, with a conservative fallback."""
    try:
        cap = getattr(pltpu.get_tpu_info(), "vmem_capacity_bytes", None)
        if cap:
            return int(cap)
    except Exception:
        pass
    return _FALLBACK_VMEM_BYTES


def _detect_num_tensorcores():
    """TensorCores per device; defaults to 1 unless hardware clearly reports 2."""
    try:
        info = pltpu.get_tpu_info()
        for name in ("num_tensorcores", "tensorcore_count", "num_cores",
                     "cores_per_chip", "core_count"):
            v = getattr(info, name, None)
            if v is not None and 1 <= int(v) <= 2:
                return int(v)
    except Exception:
        pass
    return 1


def _softmax_rows(x):
    """Numerically stable softmax over the class (lane) axis, f32, exact divide."""
    e = jnp.exp(x - jnp.max(x, axis=1, keepdims=True))
    return e / jnp.sum(e, axis=1, keepdims=True)


# --------------------------------------------------------------------------
# Kernels
# --------------------------------------------------------------------------
def _scan_single_block_kernel(anchors_ref, neighbors_ref,
                              prob_sum_ref, logsim_sum_ref):
    """Whole problem in one VMEM block: no grid, no masking, no init."""
    a_prob = _softmax_rows(anchors_ref[...].astype(jnp.float32))     # [b, n]
    n_prob = _softmax_rows(neighbors_ref[...].astype(jnp.float32))   # [b, n]

    # per-row dot product == bmm(a_prob[b,1,n], n_prob[b,n,1]).squeeze()
    similarity = jnp.sum(a_prob * n_prob, axis=1, keepdims=True)     # [b, 1]
    # BCE vs. ones == mean(-log(similarity)); PyTorch clamps log at -100.
    log_sim = jnp.maximum(jnp.log(similarity), -100.0)

    prob_sum_ref[...] = jnp.sum(a_prob, axis=0, keepdims=True)       # [1, n]
    logsim_sum_ref[...] = jnp.sum(log_sim, axis=0, keepdims=True)    # [1, 1]


def _scan_tiled_kernel(anchors_ref, neighbors_ref, prob_sum_ref, logsim_sum_ref,
                       *, batch, tile_b, tiles_per_core, num_cores):
    """Batch-streamed partial sums with resident f32 accumulators."""
    if num_cores > 1:
        c = pl.program_id(0)     # CORE_PARALLEL axis
        t = pl.program_id(1)     # batch tiles handled by this core ("arbitrary")
    else:
        c = 0
        t = pl.program_id(0)

    @pl.when(t == 0)
    def _init():
        prob_sum_ref[...] = jnp.zeros_like(prob_sum_ref)
        logsim_sum_ref[...] = jnp.zeros_like(logsim_sum_ref)

    a_prob = _softmax_rows(anchors_ref[...].astype(jnp.float32))     # [tile_b, n]
    n_prob = _softmax_rows(neighbors_ref[...].astype(jnp.float32))   # [tile_b, n]

    similarity = jnp.sum(a_prob * n_prob, axis=1, keepdims=True)     # [tile_b, 1]
    log_sim = jnp.maximum(jnp.log(similarity), -100.0)

    row0 = (c * tiles_per_core + t) * tile_b
    row_end = row0 + tile_b

    # Fast path: tile fully inside the batch — no mask math at all.
    @pl.when(row_end <= batch)
    def _full():
        prob_sum_ref[0] += jnp.sum(a_prob, axis=0, keepdims=True)
        logsim_sum_ref[0] += jnp.sum(log_sim, axis=0, keepdims=True)

    # Cold path: only the final ragged tile masks out padded rows.
    @pl.when(row_end > batch)
    def _masked():
        rows = row0 + jax.lax.broadcasted_iota(jnp.int32, (tile_b, 1), 0)
        valid = rows < batch
        prob_sum_ref[0] += jnp.sum(jnp.where(valid, a_prob, 0.0),
                                   axis=0, keepdims=True)
        logsim_sum_ref[0] += jnp.sum(jnp.where(valid, log_sim, 0.0),
                                     axis=0, keepdims=True)


# --------------------------------------------------------------------------
# Wrapper
# --------------------------------------------------------------------------
def scan_loss(anchors, neighbors, entropy_weight=5.0, tile_b=None):
    """Pallas implementation of SCANLoss.forward.

    anchors, neighbors: [b, num_classes] logits (f32 or bf16).
    Returns (total_loss, consistency_loss, entropy_loss) as f32 scalars.
    """
    b, n = anchors.shape
    itemsize = jnp.dtype(anchors.dtype).itemsize
    gran = max(8, 32 // max(1, itemsize))     # native sublane granularity per dtype

    vmem_limit = min(_vmem_capacity_bytes() // 2, 64 * 1024 * 1024)
    tile_budget = int(vmem_limit * 0.6)       # headroom for outputs / compiler scratch
    # VMEM bytes per batch row: 2 inputs x 2 pipeline buffers + f32 temporaries.
    bytes_per_row = n * (4 * itemsize + 4 * _F32_TEMPS_PER_ELEM)

    if tile_b is None and b * bytes_per_row <= tile_budget:
        # -------- single-block fast path (typical SCAN sizes) --------
        prob_sum, logsim_sum = pl.pallas_call(
            _scan_single_block_kernel,
            out_shape=(jax.ShapeDtypeStruct((1, n), jnp.float32),
                       jax.ShapeDtypeStruct((1, 1), jnp.float32)),
            in_specs=[pl.BlockSpec((b, n), lambda: (0, 0)),
                      pl.BlockSpec((b, n), lambda: (0, 0))],
            out_specs=(pl.BlockSpec((1, n), lambda: (0, 0)),
                       pl.BlockSpec((1, 1), lambda: (0, 0))),
            compiler_params=pltpu.CompilerParams(vmem_limit_bytes=vmem_limit),
        )(anchors, neighbors)
        prob_total = prob_sum[0]              # [n]
        logsim_total = logsim_sum[0, 0]       # scalar
    else:
        # -------- streamed (tiled) path for large batches --------
        num_cores = _detect_num_tensorcores()
        cap = max(gran, (tile_budget // bytes_per_row) // gran * gran)
        if tile_b is None:
            tile_b = min(_MAX_TILE_B, cap, _round_up(pl.cdiv(b, num_cores), gran))
        tile_b = max(gran, _round_up(int(tile_b), gran))

        tiles_per_core = pl.cdiv(b, num_cores * tile_b)
        padded_b = num_cores * tiles_per_core * tile_b
        if padded_b != b:
            pad = ((0, padded_b - b), (0, 0))
            anchors = jnp.pad(anchors, pad)
            neighbors = jnp.pad(neighbors, pad)

        kernel = functools.partial(_scan_tiled_kernel, batch=b, tile_b=tile_b,
                                   tiles_per_core=tiles_per_core,
                                   num_cores=num_cores)
        if num_cores > 1:
            grid = (num_cores, tiles_per_core)
            in_map = lambda c, t: (c * tiles_per_core + t, 0)
            out_map = lambda c, t: (c, 0, 0)
            semantics = (pltpu.CORE_PARALLEL, pltpu.ARBITRARY)
        else:
            grid = (tiles_per_core,)
            in_map = lambda t: (t, 0)
            out_map = lambda t: (0, 0, 0)
            semantics = ("arbitrary",)

        prob_partial, logsim_partial = pl.pallas_call(
            kernel,
            out_shape=(jax.ShapeDtypeStruct((num_cores, 1, n), jnp.float32),
                       jax.ShapeDtypeStruct((num_cores, 1, 1), jnp.float32)),
            grid=grid,
            in_specs=[pl.BlockSpec((tile_b, n), in_map),
                      pl.BlockSpec((tile_b, n), in_map)],
            out_specs=(pl.BlockSpec((1, 1, n), out_map),
                       pl.BlockSpec((1, 1, 1), out_map)),
            compiler_params=pltpu.CompilerParams(
                dimension_semantics=semantics, vmem_limit_bytes=vmem_limit),
        )(anchors, neighbors)
        prob_total = jnp.sum(prob_partial, axis=(0, 1))   # [n]
        logsim_total = jnp.sum(logsim_partial)             # scalar

    # Tiny finalize on a handful of scalars / one [n] row (plain JAX).
    consistency = -logsim_total / b
    mean_prob = prob_total / b
    mp = jnp.maximum(mean_prob, EPS)                       # torch.clamp(min=EPS)
    entropy_loss = -jnp.sum(mp * jnp.log(mp))
    total = consistency - entropy_weight * entropy_loss
    return total, consistency, entropy_loss


# --------------------------------------------------------------------------
# Reference + self-check
# --------------------------------------------------------------------------
def _scan_loss_ref(anchors, neighbors, entropy_weight=5.0):
    """Pure-JAX reference, mirroring the PyTorch module exactly."""
    a_prob = jax.nn.softmax(anchors.astype(jnp.float32), axis=1)
    n_prob = jax.nn.softmax(neighbors.astype(jnp.float32), axis=1)
    sim = jnp.sum(a_prob * n_prob, axis=1)
    consistency = -jnp.mean(jnp.maximum(jnp.log(sim), -100.0))
    mp = jnp.maximum(jnp.mean(a_prob, axis=0), EPS)
    ent = -jnp.sum(mp * jnp.log(mp))
    total = consistency - entropy_weight * ent
    return total, consistency, ent


def _check(anchors, neighbors, entropy_weight=5.0, tile_b=None):
    got = scan_loss(anchors, neighbors, entropy_weight, tile_b=tile_b)
    jax.block_until_ready(got)
    ref = _scan_loss_ref(anchors, neighbors, entropy_weight)
    for g, r in zip(got, ref):
        np.testing.assert_allclose(np.asarray(g), np.asarray(r),
                                   rtol=1e-5, atol=1e-5)
    return got


if __name__ == "__main__":
    key = jax.random.PRNGKey(0)
    k1, k2, k3, k4 = jax.random.split(key, 4)

    # Small shapes consistent with the module: [batch, num_classes] logits,
    # fed as bf16 (kernel upcasts internally) -> exercises the single-block
    # fast path.
    b, num_classes = 8, 16
    anchors = jax.random.normal(k1, (b, num_classes),
                                dtype=jnp.float32).astype(jnp.bfloat16)
    neighbors = jax.random.normal(k2, (b, num_classes),
                                  dtype=jnp.float32).astype(jnp.bfloat16)
    _check(anchors, neighbors, entropy_weight=5.0)

    # Ragged multi-tile case (forces the streamed path: tile accumulation with
    # pl.when init and pl.when-gated masking of the final ragged tile).
    b2, n2 = 300, 10
    a2 = jax.random.normal(k3, (b2, n2), dtype=jnp.float32)
    nb2 = jax.random.normal(k4, (b2, n2), dtype=jnp.float32)
    _check(a2, nb2, entropy_weight=5.0, tile_b=64)

    print("KERNEL_OK")
</pallas_src>

<mosaic_0001>
module attributes {stable_mosaic.version = 11 : i64} {
  func.func @_scan_single_block_kernel(%arg0: memref<8x16xbf16, #tpu.memory_space<vmem>>, %arg1: memref<8x16xbf16, #tpu.memory_space<vmem>>, %arg2: memref<1x16xf32, #tpu.memory_space<vmem>>, %arg3: memref<1x1xf32, #tpu.memory_space<vmem>>) attributes {dimension_semantics = [], scalar_prefetch = 0 : i64, scratch_operands = 0 : i64, tpu.core_type = #tpu.core_type<tc>} {
    %c0 = arith.constant 0 : index
    %c0_0 = arith.constant 0 : index
    %0 = vector.load %arg0[%c0, %c0_0] : memref<8x16xbf16, #tpu.memory_space<vmem>>, vector<8x16xbf16>
    %1 = arith.extf %0 : vector<8x16xbf16> to vector<8x16xf32>
    %cst = arith.constant dense<0xFF800000> : vector<8xf32>
    %2 = vector.multi_reduction <maximumf>, %1, %cst [1] : vector<8x16xf32> to vector<8xf32>
    %3 = vector.shape_cast %2 : vector<8xf32> to vector<8x1xf32>
    %4 = vector.broadcast %3 : vector<8x1xf32> to vector<8x16xf32>
    %5 = arith.subf %1, %4 : vector<8x16xf32>
    %6 = math.exp %5 : vector<8x16xf32>
    %cst_1 = arith.constant dense<0.000000e+00> : vector<8xf32>
    %7 = vector.multi_reduction <add>, %6, %cst_1 [1] : vector<8x16xf32> to vector<8xf32>
    %8 = vector.shape_cast %7 : vector<8xf32> to vector<8x1xf32>
    %9 = vector.broadcast %8 : vector<8x1xf32> to vector<8x16xf32>
    %10 = arith.divf %6, %9 : vector<8x16xf32>
    %c0_2 = arith.constant 0 : index
    %c0_3 = arith.constant 0 : index
    %11 = vector.load %arg1[%c0_2, %c0_3] : memref<8x16xbf16, #tpu.memory_space<vmem>>, vector<8x16xbf16>
    %12 = arith.extf %11 : vector<8x16xbf16> to vector<8x16xf32>
    %cst_4 = arith.constant dense<0xFF800000> : vector<8xf32>
    %13 = vector.multi_reduction <maximumf>, %12, %cst_4 [1] : vector<8x16xf32> to vector<8xf32>
    %14 = vector.shape_cast %13 : vector<8xf32> to vector<8x1xf32>
    %15 = vector.broadcast %14 : vector<8x1xf32> to vector<8x16xf32>
    %16 = arith.subf %12, %15 : vector<8x16xf32>
    %17 = math.exp %16 : vector<8x16xf32>
    %cst_5 = arith.constant dense<0.000000e+00> : vector<8xf32>
    %18 = vector.multi_reduction <add>, %17, %cst_5 [1] : vector<8x16xf32> to vector<8xf32>
    %19 = vector.shape_cast %18 : vector<8xf32> to vector<8x1xf32>
    %20 = vector.broadcast %19 : vector<8x1xf32> to vector<8x16xf32>
    %21 = arith.divf %17, %20 : vector<8x16xf32>
    %22 = arith.mulf %10, %21 : vector<8x16xf32>
    %cst_6 = arith.constant dense<0.000000e+00> : vector<8xf32>
    %23 = vector.multi_reduction <add>, %22, %cst_6 [1] : vector<8x16xf32> to vector<8xf32>
    %24 = vector.shape_cast %23 : vector<8xf32> to vector<8x1xf32>
    %25 = math.log %24 : vector<8x1xf32>
    %cst_7 = arith.constant -1.000000e+02 : f32
    %26 = vector.broadcast %cst_7 : f32 to vector<8x1xf32>
    %27 = arith.maximumf %25, %26 : vector<8x1xf32>
    %cst_8 = arith.constant dense<0.000000e+00> : vector<16xf32>
    %28 = vector.multi_reduction <add>, %10, %cst_8 [0] : vector<8x16xf32> to vector<16xf32>
    %29 = vector.shape_cast %28 : vector<16xf32> to vector<1x16xf32>
    %c0_9 = arith.constant 0 : index
    %c0_10 = arith.constant 0 : index
    %30 = vector.load %arg2[%c0_9, %c0_10] : memref<1x16xf32, #tpu.memory_space<vmem>>, vector<1x16xf32>
    tpu.vector_store %arg2[%c0_9, %c0_10], %29 {strides = array<i32>} : memref<1x16xf32, #tpu.memory_space<vmem>>, vector<1x16xf32>,
    %cst_11 = arith.constant dense<0.000000e+00> : vector<1xf32>
    %31 = vector.multi_reduction <add>, %27, %cst_11 [0] : vector<8x1xf32> to vector<1xf32>
    %32 = vector.shape_cast %31 : vector<1xf32> to vector<1x1xf32>
    %c0_12 = arith.constant 0 : index
    %c0_13 = arith.constant 0 : index
    %33 = vector.load %arg3[%c0_12, %c0_13] : memref<1x1xf32, #tpu.memory_space<vmem>>, vector<1x1xf32>
    tpu.vector_store %arg3[%c0_12, %c0_13], %32 {strides = array<i32>} : memref<1x1xf32, #tpu.memory_space<vmem>>, vector<1x1xf32>,
    return
  }
}

</mosaic_0001>

<bundles_post_ra>
// kernel: tpu_custom_call.1
= control target key start
LH: loop header
LB: loop body
LE: loop exit
PB: predicated region body
PF: predicated region fallthrough
CT: control target
= control target key end

     0   :  { %9 = vsyncpa [#allocation3], 0  ;;  %s264_s0 = inlined_call_operand.hbm [shape: bf16[8,16], index: 0, kind: input, shape index: {}]   ;;  %s265_s1 = inlined_call_operand.hbm [shape: bf16[8,16], index: 1, kind: input, shape index: {}]   ;;  %s266_s2 = inlined_call_operand.hbm [shape: f32[1,16], index: 2, kind: output, shape index: {0}]   ;;  %s267_s3 = inlined_call_operand.hbm [shape: f32[1,1], index: 3, kind: output, shape index: {1}]  }
   0x1   :  { %10 = vsyncpa [#allocation6], 0 }
   0x2   :  { %11 = vsyncpa [#allocation4], 0 }
   0x3   :  { %12 = vsyncpa [#allocation9], 0  ;;  %s222_s12 = smov [#allocation2]   ;;  %s223_s14 = smov [#allocation5]  }
   0x4   :  { %s19_s13 = sshll.u32 %s222_s12, 4  ;;  %s29_s15 = sshll.u32 %s223_s14, 4  ;;  %s20_s13 = int_to_ptr.vmem [resolvable:$true] %s19_s13  ;;  %s30_s15 = int_to_ptr.vmem [resolvable:$true] %s29_s15 }
   0x5   :  { %s142_s16 = scalar_lea.vmem %s20_s13, 64  ;;  %p147_p1 = scmp.lt.s32.totalorder %s20_s13, %s20_s13 }
   0x6   :  { %p143_p0 = scmp.ne.s32.totalorder %s20_s13, %s142_s16  ;;  %p148_p2 = scmp.lt.s32.totalorder %s142_s16, %s142_s16 }
   0x8   :  { %p149_p3 = por %p148_p2, %p147_p1 }
   0xa   :  { %p150_p4 = pnand %p149_p3, %p143_p0 }
   0xc   :  { %153 = shalt.err (!%p150_p4)
}
   0xd   :  { %22 = dma.hbm_to_vmem [thread:$0]  %s264_s0, 64, %s20_s13, [#allocation3]  }
   0xe   :  { %s162_s19 = scalar_lea.vmem %s30_s15, 64  ;;  %p167_p6 = scmp.lt.s32.totalorder %s30_s15, %s30_s15 }
   0xf   :  { %p163_p5 = scmp.ne.s32.totalorder %s30_s15, %s162_s19  ;;  %p168_p7 = scmp.lt.s32.totalorder %s162_s19, %s162_s19 }
  0x11   :  { %p169_p8 = por %p168_p7, %p167_p6 }
  0x13   :  { %p170_p9 = pnand %p169_p8, %p163_p5 }
  0x15   :  { %173 = shalt.err (!%p170_p9)
}
  0x16   :  { %32 = dma.hbm_to_vmem [thread:$0]  %s265_s1, 64, %s30_s15, [#allocation6]  }
  0x17   :  { %214 = dma.done.wait [#allocation3], 64  }
  0x18   :  { %215 = vsyncadd [#allocation3], 4294967232 }
  0x19   :  { %216 = dma.done.wait [#allocation6], 64  }
  0x1a   :  { %217 = vsyncadd [#allocation6], 4294967232  ;;  %v39_v0 = vld [vmem:[#allocation2] sm:$0xf]  ;;  %vm41_vm0 = vcmask 130048   ;;  %vm80_vm1 = vcmask 122880  }
  0x1b   :  { %v53_v1 = vld [vmem:[#allocation5] sm:$0xf]  ;;  %v40_v2 = vunpack.c.l.bf16 %v39_v0  ;;  %s224_s0 = smov [#allocation7]  }
  0x1c   :  { %v54_v3 = vunpack.c.l.bf16 %v53_v1  ;;  %s96_s1 = sshll.u32 %s224_s0, 4  ;;  %s97_s1 = int_to_ptr.vmem [resolvable:$true] %s96_s1 }
  0x1d   :  { %v42_v4 = vsel %vm41_vm0, %v40_v2, -inf  ;;  %s174_s22 = scalar_lea.vmem %s97_s1, 16  ;;  %s178_s23 = scalar_lea.vmem %s97_s1, 32 }
  0x1e   :  { %43 = vmax.xlane.f32.xlu0 %v42_v4  ;;  %v55_v5 = vsel %vm41_vm0, %v54_v3, -inf  ;;  %p175_p10 = scmp.ne.s32.totalorder %s97_s1, %s174_s22  ;;  %p179_p11 = scmp.lt.s32.totalorder %s97_s1, %s97_s1 }
  0x1f   :  { %p180_p12 = scmp.lt.s32.totalorder %s178_s23, %s174_s22 }
  0x21   :  { %p181_p13 = por %p180_p12, %p179_p11 }
  0x22   :  { %56 = vmax.xlane.f32.xlu0 %v55_v5 }
  0x23   :  { %p182_p0 = pnand %p181_p13, %p175_p10 }
  0xa7   :  { %v44_v6 = vpop.xlane.xlu0 %43 }
  0xa8   :  { %v45_v7 = vsub.f32 %v40_v2, %v44_v6 }
  0xaa   :  { %v46_v8 = vmul.f32 1.442695, %v45_v7 }
  0xab   :  { %v57_v9 = vpop.xlane.xlu0 %56 }
  0xac   :  { %124 = vpow2.f32 %v46_v8  ;;  %v58_v10 = vsub.f32 %v54_v3, %v57_v9 }
  0xae   :  { %v59_v11 = vmul.f32 1.442695, %v58_v10 }
  0xb0   :  { %126 = vpow2.f32 %v59_v11 }
  0xb9   :  { %v125_v12 = vpop.eup %124 }
  0xba   :  { %v48_v13 = vsel %vm41_vm0, %v125_v12, 0.0 }
  0xbb   :  { %49 = vadd.xlane.f32.xlu1 %v48_v13 }
  0xbd   :  { %v127_v14 = vpop.eup %126 }
  0xbe   :  { %v61_v15 = vsel %vm41_vm0, %v127_v14, 0.0 }
  0xbf   :  { %62 = vadd.xlane.f32.xlu1 %v61_v15 }
 0x144   :  { %v50_v16 = vpop.xlane.xlu1 %49 }
 0x145   :  { %128 = vrcp.f32 %v50_v16 }
 0x148   :  { %v63_v17 = vpop.xlane.xlu1 %62 }
 0x149   :  { %130 = vrcp.f32 %v63_v17 }
 0x152   :  { %v129_v18 = vpop.eup %128 }
 0x153   :  { %v52_v19 = vmul.f32 %v129_v18, %v125_v12 }
 0x155   :  { %v73_v20 = vsel %vm41_vm0, %v52_v19, 0.0 }
 0x156   :  { %v131_v21 = vpop.eup %130  ;;  %v74_v22 = vrot.slane %v73_v20, 4 }
 0x157   :  { %v65_v23 = vmul.f32 %v131_v21, %v127_v14 }
 0x158   :  { %v75_v24 = vadd.f32 %v74_v22, %v73_v20 }
 0x159   :  { %v66_v25 = vmul.f32 %v65_v23, %v52_v19 }
 0x15a   :  { %v76_v26 = vrot.slane %v75_v24, 2 }
 0x15b   :  { %v67_v27 = vsel %vm41_vm0, %v66_v25, 0.0 }
 0x15c   :  { %68 = vadd.xlane.f32.xlu0 %v67_v27  ;;  %v77_v28 = vadd.f32 %v76_v26, %v75_v24 }
 0x15e   :  { %v78_v29 = vrot.slane %v77_v28, 1 }
 0x160   :  { %v79_v30 = vadd.f32 %v78_v29, %v77_v28 }
 0x162   :  { %81 = vst.msk [vmem:[#allocation7] sm:$0x1] %vm80_vm1, %v79_v30 }
 0x163   :  { %185 = shalt.err (!%p182_p0)
}
 0x164   :  { %99 = dma.vmem_to_hbm [thread:$0]  %s97_s1, 16, %s266_s2, [#allocation4]   ;;  %vm88_vm2 = vcmask 0  }
 0x165   :  { %s225_s26 = smov [#allocation8]  }
 0x166   :  { %s106_s27 = sshll.u32 %s225_s26, 4  ;;  %s107_s27 = int_to_ptr.vmem [resolvable:$true] %s106_s27 }
 0x167   :  { %s194_s28 = scalar_lea.vmem %s107_s27, 16  ;;  %s198_s29 = scalar_lea.vmem %s107_s27, 32 }
 0x168   :  { %p195_p1 = scmp.ne.s32.totalorder %s107_s27, %s194_s28  ;;  %p199_p2 = scmp.lt.s32.totalorder %s107_s27, %s107_s27 }
 0x169   :  { %p200_p3 = scmp.lt.s32.totalorder %s198_s29, %s194_s28 }
 0x16b   :  { %p201_p4 = por %p200_p3, %p199_p2 }
 0x16d   :  { %p202_p5 = pnand %p201_p4, %p195_p1 }
 0x1e5   :  { %v69_v31 = vpop.xlane.xlu0 %68 }
 0x1e6   :  { %132 = vlog2.f32 %v69_v31 }
 0x1f3   :  { %v133_v32 = vpop.eup %132 }
 0x1f4   :  { %v71_v33 = vmul.f32 0.6931472, %v133_v32 }
 0x1f6   :  { %v72_v34 = vmax.f32 %v71_v33, -100.0 }
 0x1f8   :  { %v82_v35 = vrot.slane %v72_v34, 4 }
 0x1fa   :  { %v83_v36 = vadd.f32 %v82_v35, %v72_v34 }
 0x1fc   :  { %v84_v37 = vrot.slane %v83_v36, 2 }
 0x1fe   :  { %v85_v38 = vadd.f32 %v84_v37, %v83_v36 }
 0x200   :  { %v86_v39 = vrot.slane %v85_v38, 1 }
 0x202   :  { %v87_v40 = vadd.f32 %v86_v39, %v85_v38 }
 0x204   :  { %89 = vst.msk [vmem:[#allocation8] sm:$0x1] %vm88_vm2, %v87_v40 }
 0x205   :  { %205 = shalt.err (!%p202_p5)
}
 0x206   :  { %109 = dma.vmem_to_hbm [thread:$0]  %s107_s27, 16, %s267_s3, [#allocation9]  }
 0x207   :  { %218 = dma.done.wait [#allocation4], 16  }
 0x208   :  { %219 = vsyncadd [#allocation4], 4294967280 }
 0x209   :  { %220 = dma.done.wait [#allocation9], 16  }
 0x20a   :  { %221 = vsyncadd [#allocation9], 4294967280 }
 0x20b   :  { %116 = vsyncpa [#allocation3], 1 }
 0x20c   :  { %117 = vsyncpa [#allocation6], 1 }
 0x20d   :  { %118 = vsyncpa [#allocation4], 1 }
 0x20e   :  { %119 = vsyncpa [#allocation9], 1 }

</bundles_post_ra>
